<compile_context>
chip_gen: v5e
topology: v5e:2x2
jax: 0.10.0
libtpu: 0.0.40
codegen_flags: <defaults>
</compile_context>

<pallas_src>
import jax
import jax.numpy as jnp
import numpy as np
from jax.experimental import pallas as pl
from jax.experimental.pallas import tpu as pltpu

# ----------------------- model hyper-parameters -----------------------------
INPUT_DIM = 10      # vocab size (embedding table has INPUT_DIM + 1 rows)
EMBED_DIM = 32
HIDDEN_DIM = 32     # NOTE: fused slab layout assumes EMBED_DIM == HIDDEN_DIM
NUM_LAYERS = 2

assert EMBED_DIM == HIDDEN_DIM, "fused slab layout assumes EMBED_DIM == HIDDEN_DIM"


# ----------------------------- Pallas kernel --------------------------------
def encoder_gru_kernel(x_ref, slab_ref, h_out_ref):
    """Full per-token encoder forward: NUM_LAYERS fused GRU cells.

    slab_ref[l]: (2H+1, 4H) = [ Wf (2H, 4H) ; bf (1, 4H) ] with gate columns
      [ r | z | i_n | h_n ]:
        Wf[:Din, 0:3H]   = Wih^T                (r, z, i_n contributions of x)
        Wf[Din:, 0:2H]   = Whh^T[:, 0:2H]       (r, z contributions of h)
        Wf[Din:, 3H:4H]  = Whh^T[:, 2H:3H]      (h_n contribution of h)
        bf[0:2H]         = bih[0:2H] + bhh[0:2H]
        bf[2H:3H]        = bih[2H:3H]           (i_n bias)
        bf[3H:4H]        = bhh[2H:3H]           (h_n bias, lives inside r*(.))

    PyTorch GRU semantics:
        r  = sigmoid(x Wir^T + bir + h Whr^T + bhr)
        z  = sigmoid(x Wiz^T + biz + h Whz^T + bhz)
        n  = tanh   (x Win^T + bin + r * (h Whn^T + bhn))
        h' = (1 - z) * n + z * h
    """
    H = HIDDEN_DIM
    x = x_ref[...]                                   # (1, E)
    h0 = jnp.zeros((1, H), jnp.float32)              # zero-init hidden per layer

    hs = []
    for l in range(NUM_LAYERS):                      # unrolled: 2 layers
        xh = jnp.concatenate([x, h0], axis=-1)       # (1, 2H) = [x | h]
        w = slab_ref[l, 0:2 * H, :]                  # (2H, 4H) fused weights
        b = slab_ref[l, 2 * H:2 * H + 1, :]          # (1, 4H)  fused bias

        # single MXU push -> one lane-dense (1, 128) result vreg
        g = jnp.dot(xh, w, preferred_element_type=jnp.float32) + b

        r = jax.nn.sigmoid(g[:, 0:H])
        z = jax.nn.sigmoid(g[:, H:2 * H])
        n = jnp.tanh(g[:, 2 * H:3 * H] + r * g[:, 3 * H:4 * H])
        h_new = (1.0 - z) * n + z * h0

        hs.append(h_new)
        x = h_new                                    # input of next layer

    h_out_ref[...] = jnp.concatenate(hs, axis=0)     # (NUM_LAYERS, H)


def encoder_gru(x, slab):
    """x: (1, EMBED_DIM) embedded token; slab: (NUM_LAYERS, 2H+1, 4H)."""
    return pl.pallas_call(
        encoder_gru_kernel,
        out_shape=jax.ShapeDtypeStruct((NUM_LAYERS, HIDDEN_DIM), jnp.float32),
        grid=(1,),
        in_specs=[
            pl.BlockSpec(x.shape, lambda i: (0, 0)),
            pl.BlockSpec(slab.shape, lambda i: (0, 0, 0)),
        ],
        out_specs=pl.BlockSpec((NUM_LAYERS, HIDDEN_DIM), lambda i: (0, 0)),
        compiler_params=pltpu.CompilerParams(
            dimension_semantics=("arbitrary",)),
    )(x, slab)


# ------------------------------ parameters ----------------------------------
def init_params(key):
    """PyTorch-layout GRU params (transposed) + embedding table."""
    ks = jax.random.split(key, 2 + 4 * NUM_LAYERS)
    params = {}
    params["embedding"] = 0.1 * jax.random.normal(
        ks[0], (INPUT_DIM + 1, EMBED_DIM), jnp.float32)
    for l in range(NUM_LAYERS):
        d_in = EMBED_DIM if l == 0 else HIDDEN_DIM
        k0, k1, k2, k3 = ks[2 + 4 * l: 6 + 4 * l]
        # PyTorch stores weight_ih_l{l}: (3H, d_in); we keep the transposed
        # (d_in, 3H) copy. Gate order is PyTorch's [r | z | n].
        params[f"wih_t{l}"] = 0.1 * jax.random.normal(
            k0, (d_in, 3 * HIDDEN_DIM), jnp.float32)
        params[f"whh_t{l}"] = 0.1 * jax.random.normal(
            k1, (HIDDEN_DIM, 3 * HIDDEN_DIM), jnp.float32)
        params[f"bih{l}"] = 0.1 * jax.random.normal(
            k2, (1, 3 * HIDDEN_DIM), jnp.float32)
        params[f"bhh{l}"] = 0.1 * jax.random.normal(
            k3, (1, 3 * HIDDEN_DIM), jnp.float32)
    return params


def build_slab(params):
    """Pack per-layer (wih_t, whh_t, bih, bhh) into one (L, 2H+1, 4H) slab."""
    H = HIDDEN_DIM
    slabs = []
    for l in range(NUM_LAYERS):
        d_in = EMBED_DIM if l == 0 else HIDDEN_DIM
        wih_t = params[f"wih_t{l}"]            # (d_in, 3H)
        whh_t = params[f"whh_t{l}"]            # (H, 3H)
        bih = params[f"bih{l}"][0]             # (3H,)
        bhh = params[f"bhh{l}"][0]             # (3H,)

        wf = jnp.zeros((d_in + H, 4 * H), jnp.float32)
        wf = wf.at[:d_in, 0:3 * H].set(wih_t)                    # r, z, i_n (x)
        wf = wf.at[d_in:, 0:2 * H].set(whh_t[:, 0:2 * H])        # r, z     (h)
        wf = wf.at[d_in:, 3 * H:4 * H].set(whh_t[:, 2 * H:3 * H])  # h_n    (h)

        bf = jnp.zeros((4 * H,), jnp.float32)
        bf = bf.at[0:2 * H].set(bih[0:2 * H] + bhh[0:2 * H])     # r, z bias
        bf = bf.at[2 * H:3 * H].set(bih[2 * H:3 * H])            # i_n bias
        bf = bf.at[3 * H:4 * H].set(bhh[2 * H:3 * H])            # h_n bias

        slabs.append(jnp.concatenate([wf, bf.reshape(1, 4 * H)], axis=0))
    return jnp.stack(slabs, axis=0)            # (NUM_LAYERS, 2H+1, 4H)


# ------------------------------ forward pass --------------------------------
def encoder_forward(params, src_token):
    """src_token: scalar int token index (the PyTorch module's .view(1,1,-1)
    forces seq_len=1, batch=1)."""
    # embedding lookup + .view(1, 1, -1) -- tiny gather, plain JAX glue
    embedded = params["embedding"][src_token].reshape(1, 1, -1)   # (1, 1, E)
    x = embedded[0]                                               # (1, E)

    # whole 2-layer GRU step in a single pallas_call
    h_all = encoder_gru(x, params["slab"])                        # (L, H)

    outputs = h_all[NUM_LAYERS - 1].reshape(1, 1, HIDDEN_DIM)     # (1, 1, H)
    hidden = h_all.reshape(NUM_LAYERS, 1, HIDDEN_DIM)             # (L, 1, H)
    return outputs, hidden


# --------------------------- pure-JAX reference ------------------------------
def encoder_forward_ref(params, src_token):
    embedded = params["embedding"][src_token].reshape(1, 1, -1)
    layer_in = embedded[0]
    hiddens = []
    H = HIDDEN_DIM
    for l in range(NUM_LAYERS):
        h = jnp.zeros((1, H), jnp.float32)
        gi = layer_in @ params[f"wih_t{l}"] + params[f"bih{l}"]
        gh = h @ params[f"whh_t{l}"] + params[f"bhh{l}"]
        r = jax.nn.sigmoid(gi[:, :H] + gh[:, :H])
        z = jax.nn.sigmoid(gi[:, H:2 * H] + gh[:, H:2 * H])
        n = jnp.tanh(gi[:, 2 * H:] + r * gh[:, 2 * H:])
        h_new = (1.0 - z) * n + z * h
        hiddens.append(h_new)
        layer_in = h_new
    return layer_in.reshape(1, 1, H), jnp.stack(hiddens, axis=0)


# ---------------------------------- main -------------------------------------
if __name__ == "__main__":
    key = jax.random.PRNGKey(0)
    params = init_params(key)
    params["slab"] = build_slab(params)        # fused/packed kernel operands
    src = jnp.int32(3)                         # single source token index

    fwd = jax.jit(encoder_forward)
    outputs, hidden = fwd(params, src)
    outputs = jax.block_until_ready(outputs)
    hidden = jax.block_until_ready(hidden)

    # sanity-check against the unfused pure-JAX reference
    out_ref, hid_ref = encoder_forward_ref(params, src)
    assert outputs.shape == (1, 1, HIDDEN_DIM)
    assert hidden.shape == (NUM_LAYERS, 1, HIDDEN_DIM)
    np.testing.assert_allclose(np.asarray(outputs), np.asarray(out_ref),
                               rtol=1e-5, atol=1e-5)
    np.testing.assert_allclose(np.asarray(hidden), np.asarray(hid_ref),
                               rtol=1e-5, atol=1e-5)

    print("KERNEL_OK")
</pallas_src>

<mosaic_0001>
module attributes {stable_mosaic.version = 11 : i64} {
  func.func @encoder_gru_kernel(%arg0: i32, %arg1: memref<1x32xf32, #tpu.memory_space<vmem>>, %arg2: memref<2x65x128xf32, #tpu.memory_space<vmem>>, %arg3: memref<2x32xf32, #tpu.memory_space<vmem>>) attributes {dimension_semantics = [#tpu.dimension_semantics<arbitrary>], iteration_bounds = array<i64: 1>, scalar_prefetch = 0 : i64, scratch_operands = 0 : i64, tpu.core_type = #tpu.core_type<tc>, window_params = [{pipeline_mode = #tpu.pipeline_mode<synchronous>, transform_indices = @transform_0, window_bounds = array<i64: 1, 32>}, {pipeline_mode = #tpu.pipeline_mode<synchronous>, transform_indices = @transform_1, window_bounds = array<i64: 2, 65, 128>}, {pipeline_mode = #tpu.pipeline_mode<synchronous>, transform_indices = @transform_2, window_bounds = array<i64: 2, 32>}]} {
    %c0 = arith.constant 0 : index
    %c0_0 = arith.constant 0 : index
    %0 = vector.load %arg1[%c0, %c0_0] : memref<1x32xf32, #tpu.memory_space<vmem>>, vector<1x32xf32>
    %cst = arith.constant 0.000000e+00 : f32
    %1 = vector.broadcast %cst : f32 to vector<1x32xf32>
    %2 = tpu.concatenate %0, %1 in 1 : vector<1x32xf32>, vector<1x32xf32> -> vector<1x64xf32>
    %c0_1 = arith.constant 0 : index
    %c0_2 = arith.constant 0 : index
    %c0_3 = arith.constant 0 : index
    %3 = vector.load %arg2[%c0_1, %c0_2, %c0_3] : memref<2x65x128xf32, #tpu.memory_space<vmem>>, vector<1x64x128xf32>
    %4 = vector.shape_cast %3 : vector<1x64x128xf32> to vector<64x128xf32>
    %c0_4 = arith.constant 0 : index
    %c64 = arith.constant 64 : index
    %c0_5 = arith.constant 0 : index
    %5 = vector.load %arg2[%c0_4, %c64, %c0_5] : memref<2x65x128xf32, #tpu.memory_space<vmem>>, vector<1x1x128xf32>
    %6 = vector.shape_cast %5 : vector<1x1x128xf32> to vector<1x128xf32>
    %cst_6 = arith.constant dense<0.000000e+00> : vector<1x128xf32>
    %7 = tpu.matmul %2, %4, %cst_6 {dimension_numbers = #tpu.dot_dimension_numbers<[1], [0], [0], [1], [0, 0, 1, 1], [], []>} : vector<1x64xf32>, vector<64x128xf32>, vector<1x128xf32> -> vector<1x128xf32>
    %8 = arith.addf %7, %6 : vector<1x128xf32>
    %9 = vector.extract_strided_slice %8 {offsets = [0, 0], sizes = [1, 32], strides = [1, 1]} : vector<1x128xf32> to vector<1x32xf32>
    %10 = arith.negf %9 : vector<1x32xf32>
    %11 = math.exp %10 : vector<1x32xf32>
    %cst_7 = arith.constant 1.000000e+00 : f32
    %12 = vector.broadcast %cst_7 : f32 to vector<1x32xf32>
    %13 = arith.addf %12, %11 : vector<1x32xf32>
    %14 = arith.divf %12, %13 : vector<1x32xf32>
    %15 = vector.extract_strided_slice %8 {offsets = [0, 32], sizes = [1, 32], strides = [1, 1]} : vector<1x128xf32> to vector<1x32xf32>
    %16 = arith.negf %15 : vector<1x32xf32>
    %17 = math.exp %16 : vector<1x32xf32>
    %cst_8 = arith.constant 1.000000e+00 : f32
    %18 = vector.broadcast %cst_8 : f32 to vector<1x32xf32>
    %19 = arith.addf %18, %17 : vector<1x32xf32>
    %20 = arith.divf %18, %19 : vector<1x32xf32>
    %21 = vector.extract_strided_slice %8 {offsets = [0, 64], sizes = [1, 32], strides = [1, 1]} : vector<1x128xf32> to vector<1x32xf32>
    %22 = vector.extract_strided_slice %8 {offsets = [0, 96], sizes = [1, 32], strides = [1, 1]} : vector<1x128xf32> to vector<1x32xf32>
    %23 = arith.mulf %14, %22 : vector<1x32xf32>
    %24 = arith.addf %21, %23 : vector<1x32xf32>
    %25 = math.tanh %24 : vector<1x32xf32>
    %cst_9 = arith.constant 1.000000e+00 : f32
    %26 = vector.broadcast %cst_9 : f32 to vector<1x32xf32>
    %27 = arith.subf %26, %20 : vector<1x32xf32>
    %28 = arith.mulf %27, %25 : vector<1x32xf32>
    %29 = arith.mulf %20, %1 : vector<1x32xf32>
    %30 = arith.addf %28, %29 : vector<1x32xf32>
    %31 = tpu.concatenate %30, %1 in 1 : vector<1x32xf32>, vector<1x32xf32> -> vector<1x64xf32>
    %c1 = arith.constant 1 : index
    %c0_10 = arith.constant 0 : index
    %c0_11 = arith.constant 0 : index
    %32 = vector.load %arg2[%c1, %c0_10, %c0_11] : memref<2x65x128xf32, #tpu.memory_space<vmem>>, vector<1x64x128xf32>
    %33 = vector.shape_cast %32 : vector<1x64x128xf32> to vector<64x128xf32>
    %c1_12 = arith.constant 1 : index
    %c64_13 = arith.constant 64 : index
    %c0_14 = arith.constant 0 : index
    %34 = vector.load %arg2[%c1_12, %c64_13, %c0_14] : memref<2x65x128xf32, #tpu.memory_space<vmem>>, vector<1x1x128xf32>
    %35 = vector.shape_cast %34 : vector<1x1x128xf32> to vector<1x128xf32>
    %cst_15 = arith.constant dense<0.000000e+00> : vector<1x128xf32>
    %36 = tpu.matmul %31, %33, %cst_15 {dimension_numbers = #tpu.dot_dimension_numbers<[1], [0], [0], [1], [0, 0, 1, 1], [], []>} : vector<1x64xf32>, vector<64x128xf32>, vector<1x128xf32> -> vector<1x128xf32>
    %37 = arith.addf %36, %35 : vector<1x128xf32>
    %38 = vector.extract_strided_slice %37 {offsets = [0, 0], sizes = [1, 32], strides = [1, 1]} : vector<1x128xf32> to vector<1x32xf32>
    %39 = arith.negf %38 : vector<1x32xf32>
    %40 = math.exp %39 : vector<1x32xf32>
    %cst_16 = arith.constant 1.000000e+00 : f32
    %41 = vector.broadcast %cst_16 : f32 to vector<1x32xf32>
    %42 = arith.addf %41, %40 : vector<1x32xf32>
    %43 = arith.divf %41, %42 : vector<1x32xf32>
    %44 = vector.extract_strided_slice %37 {offsets = [0, 32], sizes = [1, 32], strides = [1, 1]} : vector<1x128xf32> to vector<1x32xf32>
    %45 = arith.negf %44 : vector<1x32xf32>
    %46 = math.exp %45 : vector<1x32xf32>
    %cst_17 = arith.constant 1.000000e+00 : f32
    %47 = vector.broadcast %cst_17 : f32 to vector<1x32xf32>
    %48 = arith.addf %47, %46 : vector<1x32xf32>
    %49 = arith.divf %47, %48 : vector<1x32xf32>
    %50 = vector.extract_strided_slice %37 {offsets = [0, 64], sizes = [1, 32], strides = [1, 1]} : vector<1x128xf32> to vector<1x32xf32>
    %51 = vector.extract_strided_slice %37 {offsets = [0, 96], sizes = [1, 32], strides = [1, 1]} : vector<1x128xf32> to vector<1x32xf32>
    %52 = arith.mulf %43, %51 : vector<1x32xf32>
    %53 = arith.addf %50, %52 : vector<1x32xf32>
    %54 = math.tanh %53 : vector<1x32xf32>
    %cst_18 = arith.constant 1.000000e+00 : f32
    %55 = vector.broadcast %cst_18 : f32 to vector<1x32xf32>
    %56 = arith.subf %55, %49 : vector<1x32xf32>
    %57 = arith.mulf %56, %54 : vector<1x32xf32>
    %58 = arith.mulf %49, %1 : vector<1x32xf32>
    %59 = arith.addf %57, %58 : vector<1x32xf32>
    %60 = tpu.concatenate %30, %59 in 0 : vector<1x32xf32>, vector<1x32xf32> -> vector<2x32xf32>
    %c0_19 = arith.constant 0 : index
    %c0_20 = arith.constant 0 : index
    %61 = vector.load %arg3[%c0_19, %c0_20] : memref<2x32xf32, #tpu.memory_space<vmem>>, vector<2x32xf32>
    tpu.vector_store %arg3[%c0_19, %c0_20], %60 {strides = array<i32>} : memref<2x32xf32, #tpu.memory_space<vmem>>, vector<2x32xf32>,
    return
  }
  func.func @transform_0(%arg0: i32) -> (i32, i32) {
    %c0_i32 = arith.constant 0 : i32
    %c0_i32_0 = arith.constant 0 : i32
    %c0_i32_1 = arith.constant 0 : i32
    return %c0_i32, %c0_i32_0 : i32, i32
  }
  func.func @transform_1(%arg0: i32) -> (i32, i32, i32) {
    %c0_i32 = arith.constant 0 : i32
    %c0_i32_0 = arith.constant 0 : i32
    %c0_i32_1 = arith.constant 0 : i32
    %c0_i32_2 = arith.constant 0 : i32
    return %c0_i32, %c0_i32_0, %c0_i32_1 : i32, i32, i32
  }
  func.func @transform_2(%arg0: i32) -> (i32, i32) {
    %c0_i32 = arith.constant 0 : i32
    %c0_i32_0 = arith.constant 0 : i32
    %c0_i32_1 = arith.constant 0 : i32
    return %c0_i32, %c0_i32_0 : i32, i32
  }
}

</mosaic_0001>

<bundles_post_ra>
// kernel: encoder_forward.1
= control target key start
LH: loop header
LB: loop body
LE: loop exit
PB: predicated region body
PF: predicated region fallthrough
CT: control target
= control target key end

     0   :  { %vm12_vm0 = vcmask 261120   ;;  %vm23_vm1 = vcmask 523264   ;;  %s205_s29 = smov 64   ;;  %s206_s30 = smov 96   ;;  %vm164_vm10 = vcmask 1040384   ;;  %vm170_vm11 = vcmask 254976   ;;  %s294_s1 = inlined_call_operand.vmem [shape: f32[2,65,128], index: 1, kind: input, shape index: {}]   ;;  %s295_s0 = inlined_call_operand.vmem [shape: f32[1,32], index: 0, kind: input, shape index: {}]   ;;  %s296_s2 = inlined_call_operand.vmem [shape: f32[2,32], index: 2, kind: output, shape index: {}]  }
   0x1   :  { %v21_v0 = vld [vmem:[%s294_s1 + $0x38] sm:$0xff]  ;;  %v20_v1 = vld [vmem:[%s294_s1 + $0x30] sm:$0xff]  ;;  %v19_v2 = vld [vmem:[%s294_s1 + $0x28] sm:$0xff] }
   0x2   :  { %35 = vmatpush.msra.mxu0 %v21_v0  ;;  %v18_v3 = vld [vmem:[%s294_s1 + $0x20] sm:$0xff]  ;;  %v17_v4 = vld [vmem:[%s294_s1 + $0x18] sm:$0xff]  ;;  %v16_v5 = vld [vmem:[%s294_s1 + $0x10] sm:$0xff] }
   0x3   :  { %v15_v6 = vld [vmem:[%s294_s1 + $0x8] sm:$0xff]  ;;  %v11_v7 = vld [vmem:[%s295_s0] sm:$0x1]  ;;  %s204_s0 = smov 32   ;;  %v184_v32 = vld [vmem:[%s294_s1 + $0x78] sm:$0xff] }
   0x4   :  { %36 = vmatpush.msra.mxu0 %v20_v1  ;;  %v14_v8 = vld [vmem:[%s294_s1] sm:$0xff]  ;;  %v13_v9 = vsel %vm12_vm0, %v11_v7, 0.0  ;;  %v183_v33 = vld [vmem:[%s294_s1 + $0x70] sm:$0xff]  ;;  %v182_v34 = vld [vmem:[%s294_s1 + $0x68] sm:$0xff] }
   0x5   :  { %v22_v10 = vld [vmem:[%s294_s1 + $0x40] sm:$0x1]  ;;  %v180_v36 = vld [vmem:[%s294_s1 + $0x58] sm:$0xff]  ;;  %v179_v37 = vld [vmem:[%s294_s1 + $0x50] sm:$0xff] }
   0x6   :  { %37 = vmatpush.msra.mxu0 %v19_v2  ;;  %v185_v31 = vld [vmem:[%s294_s1 + $0x80] sm:$0xff]  ;;  %v178_v43 = vld [vmem:[%s294_s1 + $0x48] sm:$0xff] }
   0x7   :  { %111 = vmatpush.msra.mxu1 %v185_v31  ;;  %v181_v35 = vld [vmem:[%s294_s1 + $0x60] sm:$0xff]  ;;  %v186_v46 = vld [vmem:[%s294_s1 + $0x88] sm:$0x1] }
   0x8   :  { %38 = vmatpush.msra.mxu0 %v18_v3 }
   0x9   :  { %112 = vmatpush.msra.mxu1 %v184_v32 }
   0xa   :  { %39 = vmatpush.msra.mxu0 %v17_v4 }
   0xb   :  { %113 = vmatpush.msra.mxu1 %v183_v33 }
   0xc   :  { %40 = vmatpush.msra.mxu0 %v16_v5 }
   0xd   :  { %114 = vmatpush.msra.mxu1 %v182_v34 }
   0xe   :  { %41 = vmatpush.msra.mxu0 %v15_v6 }
   0xf   :  { %115 = vmatpush.msra.mxu1 %v181_v35 }
  0x10   :  { %42 = vmatpush.msra.mxu0 %v14_v8 }
  0x11   :  { %176 = vmatmul.msk.f32.vlgmr.msra.gmra.mxu0 %vm23_vm1, %v13_v9  ;;  %116 = vmatpush.msra.mxu1 %v180_v36 }
  0x13   :  { %117 = vmatpush.msra.mxu1 %v179_v37 }
  0x15   :  { %118 = vmatpush.msra.mxu1 %v178_v43 }
  0x8e   :  { %v44_v11 = vpop.f32.mrf.mxu0 }
  0x8f   :  { %v45_v12 = vadd.f32 %v44_v11, %v22_v10 }
  0x91   :  { %67 = vrot.lane.b32.xlu0 %v45_v12, %s204_s0  ;;  %v177_v13 = vmul.f32 -1.442695, %v45_v12 }
  0x93   :  { %192 = vpow2.f32 %v177_v13 }
  0x99   :  { %v193_v14 = vpop.eup %192 }
  0x9a   :  { %v50_v15 = vadd.f32 1.0, %v193_v14 }
  0x9c   :  { %194 = vrcp.f32 %v50_v15  ;;  %v62_v21 = vand.u32 2147483648, %v50_v15  ;;  %vm56_vm3 = vweird.f32 %v50_v15  ;;  %v60_v22 = vand.u32 2147483647, %v50_v15 }
  0x9e   :  { %v63_v24 = vor.u32 1.1754944e-38, %v62_v21  ;;  %vm61_vm5 = vcmp.eq.f32.partialorder %v60_v22, 8.507059e+37 }
  0xa2   :  { %v195_v16 = vpop.eup %194 }
  0xa3   :  { %v52_v17 = vmul.f32 %v195_v16, %v50_v15  ;;  %vm57_vm2 = vweird.f32 %v195_v16 }
  0xa4   :  { %vm58_vm4 = vmor %vm56_vm3, %vm57_vm2 }
  0xa5   :  { %v53_v18 = vsub.f32 1.0, %v52_v17 }
  0xa7   :  { %v54_v19 = vmul.f32 %v195_v16, %v53_v18 }
  0xa9   :  { %v55_v20 = vadd.f32 %v195_v16, %v54_v19 }
  0xab   :  { %v59_v23 = vsel %vm58_vm4, %v195_v16, %v55_v20 }
  0xac   :  { %v64_v26 = vsel %vm61_vm5, %v63_v24, %v59_v23 }
  0xad   :  { %v77_v38 = vsub.f32 1.0, %v64_v26  ;;  %v83_v40 = vmul.f32 0.0, %v64_v26 }
 0x103   :  { %v68_v25 = vpop.permute.xlu0 %67 }
 0x104   :  { %v70_v27 = vmul.f32 %v68_v25, %v64_v26 }
 0x106   :  { %72 = vrot.lane.b32.xlu0 %v70_v27, %s205_s29 }
 0x178   :  { %v73_v28 = vpop.permute.xlu0 %72 }
 0x179   :  { %v75_v29 = vadd.f32 %v73_v28, %v45_v12 }
 0x17b   :  { %196 = vtanh.f32 %v75_v29 }
 0x181   :  { %v197_v30 = vpop.eup %196 }
 0x182   :  { %79 = vrot.lane.b32.xlu1 %v197_v30, %s206_s30 }
 0x1f4   :  { %v80_v39 = vpop.permute.xlu1 %79 }
 0x1f5   :  { %v82_v41 = vmul.f32 %v80_v39, %v77_v38 }
 0x1f7   :  { %v84_v42 = vadd.f32 %v83_v40, %v82_v41 }
 0x1f9   :  { %86 = vrot.lane.b32.xlu1 %v84_v42, %s206_s30 }
 0x26b   :  { %v87_v44 = vpop.permute.xlu1 %86 }
 0x26c   :  { %v89_v45 = vsel %vm12_vm0, %v87_v44, 0.0 }
 0x26d   :  { %187 = vmatmul.msk.f32.vlgmr.msra.gmra.mxu1 %vm23_vm1, %v89_v45 }
 0x2ea   :  { %v120_v47 = vpop.f32.mrf.mxu1 }
 0x2eb   :  { %v121_v48 = vadd.f32 %v186_v46, %v120_v47 }
 0x2ed   :  { %143 = vrot.lane.b32.xlu2 %v121_v48, %s204_s0  ;;  %v188_v49 = vmul.f32 -1.442695, %v121_v48 }
 0x2ef   :  { %198 = vpow2.f32 %v188_v49 }
 0x2f5   :  { %v199_v50 = vpop.eup %198 }
 0x2f6   :  { %v126_v51 = vadd.f32 1.0, %v199_v50 }
 0x2f8   :  { %200 = vrcp.f32 %v126_v51  ;;  %v138_v57 = vand.u32 2147483648, %v126_v51  ;;  %vm132_vm7 = vweird.f32 %v126_v51  ;;  %v136_v58 = vand.u32 2147483647, %v126_v51 }
 0x2fa   :  { %v139_v60 = vor.u32 1.1754944e-38, %v138_v57  ;;  %vm137_vm9 = vcmp.eq.f32.partialorder %v136_v58, 8.507059e+37 }
 0x2fe   :  { %v201_v52 = vpop.eup %200 }
 0x2ff   :  { %v128_v53 = vmul.f32 %v201_v52, %v126_v51  ;;  %vm133_vm6 = vweird.f32 %v201_v52 }
 0x300   :  { %vm134_vm8 = vmor %vm132_vm7, %vm133_vm6 }
 0x301   :  { %v129_v54 = vsub.f32 1.0, %v128_v53 }
 0x303   :  { %v130_v55 = vmul.f32 %v201_v52, %v129_v54 }
 0x305   :  { %v131_v56 = vadd.f32 %v201_v52, %v130_v55 }
 0x307   :  { %v135_v59 = vsel %vm134_vm8, %v201_v52, %v131_v56 }
 0x308   :  { %v140_v62 = vsel %vm137_vm9, %v139_v60, %v135_v59 }
 0x309   :  { %v153_v3 = vsub.f32 1.0, %v140_v62  ;;  %v159_v5 = vmul.f32 0.0, %v140_v62 }
 0x347   :  { %v144_v61 = vpop.permute.xlu2 %143 }
 0x348   :  { %v146_v63 = vmul.f32 %v144_v61, %v140_v62 }
 0x34a   :  { %148 = vrot.lane.b32.xlu2 %v146_v63, %s205_s29 }
 0x3a4   :  { %v149_v0 = vpop.permute.xlu2 %148 }
 0x3a5   :  { %v151_v1 = vadd.f32 %v149_v0, %v121_v48 }
 0x3a7   :  { %202 = vtanh.f32 %v151_v1 }
 0x3ad   :  { %v203_v2 = vpop.eup %202 }
 0x3ae   :  { %155 = vrot.lane.b32.xlu0 %v203_v2, %s206_s30 }
 0x420   :  { %v156_v4 = vpop.permute.xlu0 %155 }
 0x421   :  { %v158_v6 = vmul.f32 %v156_v4, %v153_v3 }
 0x423   :  { %v160_v7 = vadd.f32 %v159_v5, %v158_v6 }
 0x425   :  { %v162_v8 = vrot.slane %v160_v7, 7 }
 0x427   :  { %v165_v9 = vsel %vm164_vm10, %v84_v42, %v162_v8 }
 0x428   :  { %167 = vrot.lane.b32.xlu1 %v165_v9, %s206_s30 }
 0x49a   :  { %v168_v10 = vpop.permute.xlu1 %167 }
 0x49b   :  { %171 = vst.msk [vmem:[%s296_s2] sm:$0x3] %vm170_vm11, %v168_v10 }

</bundles_post_ra>
